<compile_context>
chip_gen: v7x
topology: tpu7x:2x2x1
jax: 0.10.0
libtpu: 0.0.40
codegen_flags: <defaults>
</compile_context>

<pallas_src>
import math
from functools import partial

import jax
import jax.numpy as jnp
from jax.experimental import pallas as pl
from jax.experimental.pallas import tpu as pltpu


def _softplus_and_sigmoid(z):
    """torch.nn.Softplus(beta=1, threshold=20) and its derivative, sharing one exp."""
    e = jnp.exp(jnp.minimum(z, 20.0))
    sp = jnp.where(z > 20.0, z, jnp.log1p(e))
    # Exact division keeps 1e-5 parity with the f32 autodiff reference
    # (pl.reciprocal(approx=True) would trade a few ULPs for an EUP-slot win).
    sg = jnp.where(z > 20.0, 1.0, e / (1.0 + e))
    return sp, sg


def pixelreg_kernel(x_ref, w1_ref, b1_ref, w2_ref, b2_ref, w3b_ref, b3p_ref,
                    out_ref, *, matmul_dtype=jnp.float32):
    x = x_ref[...]                   # (TB, 2)
    w1 = w1_ref[...]                 # (2, H)
    tb = x.shape[0]

    # ---- layer 1: K=2 contraction on the VPU (two broadcast FMAs, no MXU) ----
    z1 = x[:, 0:1] * w1[0:1, :] + x[:, 1:2] * w1[1:2, :] + b1_ref[...]      # (TB, H)
    h1, s1 = _softplus_and_sigmoid(z1)

    # ---- layer 2: one fused MXU pass for forward + both Jacobian columns ----
    # dz1/dx_j = W1[j, :]  ->  dh1/dx_j = s1 * W1[j, :]
    a0 = s1 * w1[0:1, :]
    a1 = s1 * w1[1:2, :]
    lhs2 = jnp.concatenate([h1, a0, a1], axis=0).astype(matmul_dtype)       # (3TB, H)
    y2 = jnp.dot(lhs2, w2_ref[...].astype(matmul_dtype),
                 preferred_element_type=jnp.float32)                        # (3TB, H)

    z2 = y2[0:tb, :] + b2_ref[...]
    h2, s2 = _softplus_and_sigmoid(z2)
    t0 = y2[tb:2 * tb, :] * s2       # dh2/dx_0
    t1 = y2[2 * tb:3 * tb, :] * s2   # dh2/dx_1

    # ---- layer 3: lane-packed block-diagonal RHS -> (TB, 8) output directly ----
    # cols 0:2 = dx, 2:4 = d dx/dx_0, 4:6 = d dx/dx_1, 6:8 = zero padding.
    lhs3 = jnp.concatenate([h2, t0, t1], axis=1).astype(matmul_dtype)       # (TB, 3H)
    out_ref[...] = (jnp.dot(lhs3, w3b_ref[...].astype(matmul_dtype),
                            preferred_element_type=jnp.float32)
                    + b3p_ref[...])


def pixelreg_forward(x, params, *, tb=None, matmul_dtype=jnp.float32):
    """PixelRegAutoEncoder.forward(x, compute_jacobian=True) -> (dx, jacobian)."""
    B = x.shape[0]
    w1t, b1, w2t, b2, w3t, b3 = params
    H = w2t.shape[0]

    # Block-diagonal, lane-packed RHS/bias for the final layer (built on the host
    # side; (3H, 8) f32 is tiny and stays VMEM-resident inside the kernel).
    w3_block = jnp.zeros((3 * H, 8), jnp.float32)
    w3_block = w3_block.at[0:H, 0:2].set(w3t)
    w3_block = w3_block.at[H:2 * H, 2:4].set(w3t)
    w3_block = w3_block.at[2 * H:3 * H, 4:6].set(w3t)
    b3_packed = jnp.zeros((1, 8), jnp.float32).at[:, 0:2].set(b3)

    # Batch tile: sublane-aligned, sized so the (3*TB, H) f32 activation slabs
    # stay well inside the v7x 32 MiB scoped-VMEM default.
    if tb is None:
        tb = min(B, 512)
    if tb % 8 != 0:
        tb = B                       # single block equal to the full batch dim

    grid = (pl.cdiv(B, tb),)
    const = lambda i: (0, 0)         # weights/biases: resident, never re-fetched

    packed = pl.pallas_call(
        partial(pixelreg_kernel, matmul_dtype=matmul_dtype),
        out_shape=jax.ShapeDtypeStruct((B, 8), jnp.float32),
        grid=grid,
        in_specs=[
            pl.BlockSpec((tb, 2), lambda i: (i, 0)),          # x
            pl.BlockSpec(w1t.shape, const),                   # W1 (2, H)
            pl.BlockSpec(b1.shape, const),                    # b1 (1, H)
            pl.BlockSpec(w2t.shape, const),                   # W2 (H, H)
            pl.BlockSpec(b2.shape, const),                    # b2 (1, H)
            pl.BlockSpec(w3_block.shape, const),              # W3 block-diag (3H, 8)
            pl.BlockSpec(b3_packed.shape, const),             # b3 packed     (1, 8)
        ],
        out_specs=pl.BlockSpec((tb, 8), lambda i: (i, 0)),
        compiler_params=pltpu.CompilerParams(
            dimension_semantics=("parallel",)),
    )(x, w1t, b1, w2t, b2, w3_block, b3_packed)

    dx = packed[:, 0:2]
    jac = jnp.stack([packed[:, 2:4], packed[:, 4:6]], axis=-1)   # (B, 2, 2)
    return dx, jac


def init_params(key, nhid=128, nlatent=2):
    """torch.nn.Linear-style uniform init, deterministic from `key`."""
    def lin(k, fan_in, fan_out):
        kw, kb = jax.random.split(k)
        bound = 1.0 / math.sqrt(fan_in)
        w = jax.random.uniform(kw, (fan_in, fan_out), jnp.float32, -bound, bound)
        b = jax.random.uniform(kb, (1, fan_out), jnp.float32, -bound, bound)
        return w, b
    k1, k2, k3 = jax.random.split(key, 3)
    w1, b1 = lin(k1, nlatent, nhid)
    w2, b2 = lin(k2, nhid, nhid)
    w3, b3 = lin(k3, nhid, nlatent)
    return (w1, b1, w2, b2, w3, b3)


def _ref_forward(x, params):
    w1, b1, w2, b2, w3, b3 = params
    h1 = jax.nn.softplus(x @ w1 + b1[0])
    h2 = jax.nn.softplus(h1 @ w2 + b2[0])
    return h2 @ w3 + b3[0]


# TODO(synk): the `_norm` branch (x @ inv(A) with A loaded from norm.txt) needs an
# external file and is disabled by default (norm=False), so it is not implemented.
# The unused MLPAutoencoder (encode/decode) is not part of forward() and is omitted.

if __name__ == "__main__":
    key = jax.random.PRNGKey(0)
    kp, kx = jax.random.split(key)

    B, NHID, NLATENT = 8, 128, 2          # small, TPU-friendly shapes
    params = init_params(kp, nhid=NHID, nlatent=NLATENT)
    x = jax.random.normal(kx, (B, NLATENT), jnp.float32)

    dx, jac = pixelreg_forward(x, params)
    jax.block_until_ready((dx, jac))

    # correctness check against pure-JAX reference (forward + autodiff Jacobian)
    dx_ref = _ref_forward(x, params)
    jac_ref = jax.vmap(jax.jacfwd(lambda xi: _ref_forward(xi[None, :], params)[0]))(x)

    assert jnp.allclose(dx, dx_ref, atol=1e-5, rtol=1e-5), "dx mismatch"
    assert jnp.allclose(jac, jac_ref, atol=1e-5, rtol=1e-5), "jacobian mismatch"

    print("KERNEL_OK")
</pallas_src>

<mosaic_0001>
module attributes {stable_mosaic.version = 11 : i64} {
  func.func @pixelreg_kernel(%arg0: i32, %arg1: memref<8x2xf32, #tpu.memory_space<vmem>>, %arg2: memref<2x128xf32, #tpu.memory_space<vmem>>, %arg3: memref<1x128xf32, #tpu.memory_space<vmem>>, %arg4: memref<128x128xf32, #tpu.memory_space<vmem>>, %arg5: memref<1x128xf32, #tpu.memory_space<vmem>>, %arg6: memref<384x8xf32, #tpu.memory_space<vmem>>, %arg7: memref<1x8xf32, #tpu.memory_space<vmem>>, %arg8: memref<8x8xf32, #tpu.memory_space<vmem>>) attributes {dimension_semantics = [#tpu.dimension_semantics<parallel>], iteration_bounds = array<i64: 1>, scalar_prefetch = 0 : i64, scratch_operands = 0 : i64, tpu.core_type = #tpu.core_type<tc>, window_params = [{transform_indices = @transform_0, window_bounds = array<i64: 8, 2>}, {pipeline_mode = #tpu.pipeline_mode<synchronous>, transform_indices = @transform_1, window_bounds = array<i64: 2, 128>}, {pipeline_mode = #tpu.pipeline_mode<synchronous>, transform_indices = @transform_2, window_bounds = array<i64: 1, 128>}, {pipeline_mode = #tpu.pipeline_mode<synchronous>, transform_indices = @transform_3, window_bounds = array<i64: 128, 128>}, {pipeline_mode = #tpu.pipeline_mode<synchronous>, transform_indices = @transform_4, window_bounds = array<i64: 1, 128>}, {pipeline_mode = #tpu.pipeline_mode<synchronous>, transform_indices = @transform_5, window_bounds = array<i64: 384, 8>}, {pipeline_mode = #tpu.pipeline_mode<synchronous>, transform_indices = @transform_6, window_bounds = array<i64: 1, 8>}, {transform_indices = @transform_7, window_bounds = array<i64: 8, 8>}]} {
    %c0 = arith.constant 0 : index
    %c0_0 = arith.constant 0 : index
    %0 = vector.load %arg1[%c0, %c0_0] : memref<8x2xf32, #tpu.memory_space<vmem>>, vector<8x2xf32>
    %c0_1 = arith.constant 0 : index
    %c0_2 = arith.constant 0 : index
    %1 = vector.load %arg2[%c0_1, %c0_2] : memref<2x128xf32, #tpu.memory_space<vmem>>, vector<2x128xf32>
    %2 = vector.extract_strided_slice %0 {offsets = [0, 0], sizes = [8, 1], strides = [1, 1]} : vector<8x2xf32> to vector<8x1xf32>
    %3 = vector.extract_strided_slice %1 {offsets = [0, 0], sizes = [1, 128], strides = [1, 1]} : vector<2x128xf32> to vector<1x128xf32>
    %4 = vector.broadcast %2 : vector<8x1xf32> to vector<8x128xf32>
    %5 = vector.broadcast %3 : vector<1x128xf32> to vector<8x128xf32>
    %6 = arith.mulf %4, %5 : vector<8x128xf32>
    %7 = vector.extract_strided_slice %0 {offsets = [0, 1], sizes = [8, 1], strides = [1, 1]} : vector<8x2xf32> to vector<8x1xf32>
    %8 = vector.extract_strided_slice %1 {offsets = [1, 0], sizes = [1, 128], strides = [1, 1]} : vector<2x128xf32> to vector<1x128xf32>
    %9 = vector.broadcast %7 : vector<8x1xf32> to vector<8x128xf32>
    %10 = vector.broadcast %8 : vector<1x128xf32> to vector<8x128xf32>
    %11 = arith.mulf %9, %10 : vector<8x128xf32>
    %12 = arith.addf %6, %11 : vector<8x128xf32>
    %c0_3 = arith.constant 0 : index
    %c0_4 = arith.constant 0 : index
    %13 = vector.load %arg3[%c0_3, %c0_4] : memref<1x128xf32, #tpu.memory_space<vmem>>, vector<1x128xf32>
    %14 = vector.broadcast %13 : vector<1x128xf32> to vector<8x128xf32>
    %15 = arith.addf %12, %14 : vector<8x128xf32>
    %cst = arith.constant 2.000000e+01 : f32
    %16 = vector.broadcast %cst : f32 to vector<8x128xf32>
    %17 = arith.minimumf %15, %16 : vector<8x128xf32>
    %18 = math.exp %17 : vector<8x128xf32>
    %cst_5 = arith.constant 2.000000e+01 : f32
    %19 = vector.broadcast %cst_5 : f32 to vector<8x128xf32>
    %20 = arith.cmpf ogt, %15, %19 : vector<8x128xf32>
    %21 = math.log1p %18 : vector<8x128xf32>
    %22 = arith.select %20, %15, %21 : vector<8x128xi1>, vector<8x128xf32>
    %cst_6 = arith.constant 2.000000e+01 : f32
    %23 = vector.broadcast %cst_6 : f32 to vector<8x128xf32>
    %24 = arith.cmpf ogt, %15, %23 : vector<8x128xf32>
    %cst_7 = arith.constant 1.000000e+00 : f32
    %25 = vector.broadcast %cst_7 : f32 to vector<8x128xf32>
    %26 = arith.addf %25, %18 : vector<8x128xf32>
    %27 = arith.divf %18, %26 : vector<8x128xf32>
    %cst_8 = arith.constant 1.000000e+00 : f32
    %28 = vector.broadcast %cst_8 : f32 to vector<8x128xf32>
    %29 = arith.select %24, %28, %27 : vector<8x128xi1>, vector<8x128xf32>
    %30 = vector.extract_strided_slice %1 {offsets = [0, 0], sizes = [1, 128], strides = [1, 1]} : vector<2x128xf32> to vector<1x128xf32>
    %31 = vector.broadcast %30 : vector<1x128xf32> to vector<8x128xf32>
    %32 = arith.mulf %29, %31 : vector<8x128xf32>
    %33 = vector.extract_strided_slice %1 {offsets = [1, 0], sizes = [1, 128], strides = [1, 1]} : vector<2x128xf32> to vector<1x128xf32>
    %34 = vector.broadcast %33 : vector<1x128xf32> to vector<8x128xf32>
    %35 = arith.mulf %29, %34 : vector<8x128xf32>
    %36 = tpu.concatenate %22, %32, %35 in 0 : vector<8x128xf32>, vector<8x128xf32>, vector<8x128xf32> -> vector<24x128xf32>
    %c0_9 = arith.constant 0 : index
    %c0_10 = arith.constant 0 : index
    %37 = vector.load %arg4[%c0_9, %c0_10] : memref<128x128xf32, #tpu.memory_space<vmem>>, vector<128x128xf32>
    %cst_11 = arith.constant dense<0.000000e+00> : vector<24x128xf32>
    %38 = tpu.matmul %36, %37, %cst_11 {dimension_numbers = #tpu.dot_dimension_numbers<[1], [0], [0], [1], [0, 0, 1, 1], [], []>} : vector<24x128xf32>, vector<128x128xf32>, vector<24x128xf32> -> vector<24x128xf32>
    %39 = vector.extract_strided_slice %38 {offsets = [0, 0], sizes = [8, 128], strides = [1, 1]} : vector<24x128xf32> to vector<8x128xf32>
    %c0_12 = arith.constant 0 : index
    %c0_13 = arith.constant 0 : index
    %40 = vector.load %arg5[%c0_12, %c0_13] : memref<1x128xf32, #tpu.memory_space<vmem>>, vector<1x128xf32>
    %41 = vector.broadcast %40 : vector<1x128xf32> to vector<8x128xf32>
    %42 = arith.addf %39, %41 : vector<8x128xf32>
    %cst_14 = arith.constant 2.000000e+01 : f32
    %43 = vector.broadcast %cst_14 : f32 to vector<8x128xf32>
    %44 = arith.minimumf %42, %43 : vector<8x128xf32>
    %45 = math.exp %44 : vector<8x128xf32>
    %cst_15 = arith.constant 2.000000e+01 : f32
    %46 = vector.broadcast %cst_15 : f32 to vector<8x128xf32>
    %47 = arith.cmpf ogt, %42, %46 : vector<8x128xf32>
    %48 = math.log1p %45 : vector<8x128xf32>
    %49 = arith.select %47, %42, %48 : vector<8x128xi1>, vector<8x128xf32>
    %cst_16 = arith.constant 2.000000e+01 : f32
    %50 = vector.broadcast %cst_16 : f32 to vector<8x128xf32>
    %51 = arith.cmpf ogt, %42, %50 : vector<8x128xf32>
    %cst_17 = arith.constant 1.000000e+00 : f32
    %52 = vector.broadcast %cst_17 : f32 to vector<8x128xf32>
    %53 = arith.addf %52, %45 : vector<8x128xf32>
    %54 = arith.divf %45, %53 : vector<8x128xf32>
    %cst_18 = arith.constant 1.000000e+00 : f32
    %55 = vector.broadcast %cst_18 : f32 to vector<8x128xf32>
    %56 = arith.select %51, %55, %54 : vector<8x128xi1>, vector<8x128xf32>
    %57 = vector.extract_strided_slice %38 {offsets = [8, 0], sizes = [8, 128], strides = [1, 1]} : vector<24x128xf32> to vector<8x128xf32>
    %58 = arith.mulf %57, %56 : vector<8x128xf32>
    %59 = vector.extract_strided_slice %38 {offsets = [16, 0], sizes = [8, 128], strides = [1, 1]} : vector<24x128xf32> to vector<8x128xf32>
    %60 = arith.mulf %59, %56 : vector<8x128xf32>
    %61 = tpu.concatenate %49, %58, %60 in 1 : vector<8x128xf32>, vector<8x128xf32>, vector<8x128xf32> -> vector<8x384xf32>
    %c0_19 = arith.constant 0 : index
    %c0_20 = arith.constant 0 : index
    %62 = vector.load %arg6[%c0_19, %c0_20] : memref<384x8xf32, #tpu.memory_space<vmem>>, vector<384x8xf32>
    %cst_21 = arith.constant dense<0.000000e+00> : vector<8x8xf32>
    %63 = tpu.matmul %61, %62, %cst_21 {dimension_numbers = #tpu.dot_dimension_numbers<[1], [0], [0], [1], [0, 0, 1, 1], [], []>} : vector<8x384xf32>, vector<384x8xf32>, vector<8x8xf32> -> vector<8x8xf32>
    %c0_22 = arith.constant 0 : index
    %c0_23 = arith.constant 0 : index
    %64 = vector.load %arg7[%c0_22, %c0_23] : memref<1x8xf32, #tpu.memory_space<vmem>>, vector<1x8xf32>
    %65 = vector.broadcast %64 : vector<1x8xf32> to vector<8x8xf32>
    %66 = arith.addf %63, %65 : vector<8x8xf32>
    %c0_24 = arith.constant 0 : index
    %c0_25 = arith.constant 0 : index
    %67 = vector.load %arg8[%c0_24, %c0_25] : memref<8x8xf32, #tpu.memory_space<vmem>>, vector<8x8xf32>
    tpu.vector_store %arg8[%c0_24, %c0_25], %66 {strides = array<i32>} : memref<8x8xf32, #tpu.memory_space<vmem>>, vector<8x8xf32>,
    return
  }
  func.func @transform_0(%arg0: i32) -> (i32, i32) {
    %c0_i32 = arith.constant 0 : i32
    %c0_i32_0 = arith.constant 0 : i32
    return %arg0, %c0_i32 : i32, i32
  }
  func.func @transform_1(%arg0: i32) -> (i32, i32) {
    %c0_i32 = arith.constant 0 : i32
    %c0_i32_0 = arith.constant 0 : i32
    %c0_i32_1 = arith.constant 0 : i32
    return %c0_i32, %c0_i32_0 : i32, i32
  }
  func.func @transform_2(%arg0: i32) -> (i32, i32) {
    %c0_i32 = arith.constant 0 : i32
    %c0_i32_0 = arith.constant 0 : i32
    %c0_i32_1 = arith.constant 0 : i32
    return %c0_i32, %c0_i32_0 : i32, i32
  }
  func.func @transform_3(%arg0: i32) -> (i32, i32) {
    %c0_i32 = arith.constant 0 : i32
    %c0_i32_0 = arith.constant 0 : i32
    %c0_i32_1 = arith.constant 0 : i32
    return %c0_i32, %c0_i32_0 : i32, i32
  }
  func.func @transform_4(%arg0: i32) -> (i32, i32) {
    %c0_i32 = arith.constant 0 : i32
    %c0_i32_0 = arith.constant 0 : i32
    %c0_i32_1 = arith.constant 0 : i32
    return %c0_i32, %c0_i32_0 : i32, i32
  }
  func.func @transform_5(%arg0: i32) -> (i32, i32) {
    %c0_i32 = arith.constant 0 : i32
    %c0_i32_0 = arith.constant 0 : i32
    %c0_i32_1 = arith.constant 0 : i32
    return %c0_i32, %c0_i32_0 : i32, i32
  }
  func.func @transform_6(%arg0: i32) -> (i32, i32) {
    %c0_i32 = arith.constant 0 : i32
    %c0_i32_0 = arith.constant 0 : i32
    %c0_i32_1 = arith.constant 0 : i32
    return %c0_i32, %c0_i32_0 : i32, i32
  }
  func.func @transform_7(%arg0: i32) -> (i32, i32) {
    %c0_i32 = arith.constant 0 : i32
    %c0_i32_0 = arith.constant 0 : i32
    return %arg0, %c0_i32 : i32, i32
  }
}

</mosaic_0001>

<bundles_post_ra>
// kernel: tpu_custom_call.1
= control target key start
LH: loop header
LB: loop body
LE: loop exit
PB: predicated region body
PF: predicated region fallthrough
CT: control target
= control target key end

     0   :  { %v686_v1 = vmov 0   ;;  %s975_s0 = inlined_call_operand.vmem [shape: f32[8,2], index: 0, kind: input, shape index: {}]   ;;  %s976_s1 = inlined_call_operand.vmem [shape: f32[2,128], index: 1, kind: input, shape index: {}]   ;;  %s977_s2 = inlined_call_operand.vmem [shape: f32[1,128], index: 2, kind: input, shape index: {}]   ;;  %s978_s3 = inlined_call_operand.vmem [shape: f32[128,128], index: 3, kind: input, shape index: {}]   ;;  %s979_s4 = inlined_call_operand.vmem [shape: f32[1,128], index: 4, kind: input, shape index: {}]   ;;  %s980_s5 = inlined_call_operand.vmem [shape: f32[384,8], index: 5, kind: input, shape index: {}]   ;;  %s981_s6 = inlined_call_operand.vmem [shape: f32[1,8], index: 6, kind: input, shape index: {}]   ;;  %s982_s7 = inlined_call_operand.hbm [shape: f32[8,8], index: 7, kind: output, shape index: {}]  }
   0x1   :  { %v27_v0 = vld [vmem:[%s975_s0] sm:$0xff]  ;;  %648 = vset.pattern.permute.xlu0 %v686_v1 }
   0x2   :  { %12 = vsyncpa [#allocation3], 0  ;;  %31 = vperm.xlu0 %648, %v27_v0   ;;  %v687_v2 = vmov 1   ;;  %v77_v3 = vld [vmem:[%s978_s3] sm:$0xff]  ;;  %v78_v4 = vld [vmem:[%s978_s3 + $0x8] sm:$0xff]  ;;  %v688_v6 = vmov 0.0|0.0   ;;  %v34_v29 = vlaneseq }
   0x3   :  { %v563_v5 = vpack.c.bf16 %v78_v4, %v77_v3  ;;  %562 = vmatprep.subr.bf16.mxu0 %v688_v6  ;;  %v79_v7 = vld [vmem:[%s978_s3 + $0x10] sm:$0xff]  ;;  %v80_v8 = vld [vmem:[%s978_s3 + $0x18] sm:$0xff]  ;;  %v81_v10 = vld [vmem:[%s978_s3 + $0x20] sm:$0xff]  ;;  %vm689_vm0 = vmmov 0   ;;  %v690_v13 = vmov 0.0   ;;  %s691_s28 = smov [#allocation2]  }
   0x4   :  { %v566_v9 = vpack.c.bf16 %v80_v8, %v79_v7  ;;  %v82_v11 = vld [vmem:[%s978_s3 + $0x28] sm:$0xff]  ;;  %518 = vmatprep.mubr.msk.f32.mxu0 %vm689_vm0, %v690_v13  ;;  %v83_v14 = vld [vmem:[%s978_s3 + $0x30] sm:$0xff]  ;;  %v84_v15 = vld [vmem:[%s978_s3 + $0x38] sm:$0xff]  ;;  %v35_v30 = vshrl.u32 %v34_v29, 7  ;;  %s404_s29 = sshll.u32 %s691_s28, 4  ;;  %vm396_vm5 = vcmask 64512   ;;  %s405_s29 = int_to_ptr.vmem [resolvable:$true] %s404_s29 }
   0x5   :  { %564 = vmatpush3.bf16.msra.mxu0 %v563_v5  ;;  %v569_v12 = vpack.c.bf16 %v82_v11, %v81_v10  ;;  %v572_v16 = vpack.c.bf16 %v84_v15, %v83_v14  ;;  %v85_v17 = vld [vmem:[%s978_s3 + $0x40] sm:$0xff]  ;;  %v86_v18 = vld [vmem:[%s978_s3 + $0x48] sm:$0xff]  ;;  %v87_v20 = vld [vmem:[%s978_s3 + $0x50] sm:$0xff]  ;;  %s662_s0 = scalar_lea.vmem %s405_s29, 128  ;;  %p667_p1 = scmp.lt.s32.totalorder %s405_s29, %s405_s29 }
   0x6   :  { %649 = vset.pattern.permute.xlu0 %v687_v2  ;;  %565 = vmatprep.subr.bf16.mxu0 %v688_v6  ;;  %v575_v19 = vpack.c.bf16 %v86_v18, %v85_v17  ;;  %v88_v21 = vld [vmem:[%s978_s3 + $0x58] sm:$0xff]  ;;  %v89_v23 = vld [vmem:[%s978_s3 + $0x60] sm:$0xff]  ;;  %v90_v24 = vld [vmem:[%s978_s3 + $0x68] sm:$0xff]  ;;  %v36_v31 = vsub.s32 0, %v35_v30  ;;  %v45_v32 = vsub.s32 1, %v35_v30  ;;  %p663_p0 = scmp.ne.s32.totalorder %s405_s29, %s662_s0  ;;  %p668_p2 = scmp.lt.s32.totalorder %s662_s0, %s662_s0 }
   0x7   :  { %40 = vperm.xlu0 %649, %v27_v0   ;;  %v578_v22 = vpack.c.bf16 %v88_v21, %v87_v20  ;;  %v581_v25 = vpack.c.bf16 %v90_v24, %v89_v23  ;;  %v91_v26 = vld [vmem:[%s978_s3 + $0x70] sm:$0xff]  ;;  %v92_v27 = vld [vmem:[%s978_s3 + $0x78] sm:$0xff]  ;;  %v28_v33 = vld [vmem:[%s976_s1] sm:$0x3] }
   0x8   :  { %v584_v28 = vpack.c.bf16 %v92_v27, %v91_v26  ;;  %v37_v35 = vrot.slane %v28_v33, %v36_v31  ;;  %v46_v36 = vrot.slane %v28_v33, %v45_v32  ;;  %v412_v40 = vld [vmem:[%s977_s2] ss:$0 sm:$0xff]  ;;  %v218_v61 = vld [vmem:[%s980_s5 + $0x88] sm:$0xff]  ;;  %v219_v5 = vld [vmem:[%s980_s5 + $0x90] sm:$0xff]  ;;  %p669_p3 = por %p668_p2, %p667_p1 }
   0x9   :  { %567 = vmatpush3.bf16.msra.mxu0 %v566_v9  ;;  %v217_v60 = vld [vmem:[%s980_s5 + $0x80] sm:$0xff]  ;;  %v234_v0 = vld [vmem:[%s980_s5 + $0x108] sm:$0xff]  ;;  %v220_v7 = vld [vmem:[%s980_s5 + $0x98] sm:$0xff] }
   0xa   :  { %568 = vmatprep.subr.bf16.mxu0 %v688_v6  ;;  %v233_v62 = vld [vmem:[%s980_s5 + $0x100] sm:$0xff]  ;;  %v586_v63 = vpack.c.bf16 %v218_v61, %v217_v60  ;;  %v202_v2 = vld [vmem:[%s980_s5 + $0x8] sm:$0xff]  ;;  %v235_v8 = vld [vmem:[%s980_s5 + $0x110] sm:$0xff]  ;;  %v590_v9 = vpack.c.bf16 %v220_v7, %v219_v5  ;;  %p670_p4 = pnand %p669_p3, %p663_p0 }
   0xb   :  { %v201_v1 = vld [vmem:[%s980_s5] sm:$0xff]  ;;  %v619_v3 = vpack.c.bf16 %v234_v0, %v233_v62  ;;  %v236_v10 = vld [vmem:[%s980_s5 + $0x118] sm:$0xff]  ;;  %v203_v11 = vld [vmem:[%s980_s5 + $0x10] sm:$0xff] }
   0xc   :  { %v588_v4 = vpack.c.bf16 %v202_v2, %v201_v1  ;;  %587 = vmatprep.subr.bf16.mxu1 %v586_v63  ;;  %v221_v15 = vld [vmem:[%s980_s5 + $0xa0] sm:$0xff]  ;;  %v206_v21 = vld [vmem:[%s980_s5 + $0x28] sm:$0xff]  ;;  %v223_v24 = vld [vmem:[%s980_s5 + $0xb0] sm:$0xff] }
   0xd   :  { %570 = vmatpush3.bf16.msra.mxu0 %v569_v12  ;;  %v204_v12 = vld [vmem:[%s980_s5 + $0x18] sm:$0xff]  ;;  %v237_v17 = vld [vmem:[%s980_s5 + $0x120] sm:$0xff]  ;;  %v239_v26 = vld [vmem:[%s980_s5 + $0x130] sm:$0xff] }
   0xe   :  { %571 = vmatprep.subr.bf16.mxu0 %v688_v6  ;;  %589 = vmatpush3.bf16.msra.mxu1 %v588_v4  ;;  %v592_v14 = vpack.c.bf16 %v204_v12, %v203_v11  ;;  %v205_v20 = vld [vmem:[%s980_s5 + $0x20] sm:$0xff]  ;;  %v207_v29 = vld [vmem:[%s980_s5 + $0x30] sm:$0xff]  ;;  %v208_v30 = vld [vmem:[%s980_s5 + $0x38] sm:$0xff] }
   0xf   :  { %591 = vmatprep.subr.bf16.mxu1 %v590_v9  ;;  %v596_v23 = vpack.c.bf16 %v206_v21, %v205_v20  ;;  %v600_v32 = vpack.c.bf16 %v208_v30, %v207_v29  ;;  %v225_v33 = vld [vmem:[%s980_s5 + $0xc0] sm:$0xff]  ;;  %v231_v60 = vld [vmem:[%s980_s5 + $0xf0] sm:$0xff]  ;;  %v232_v61 = vld [vmem:[%s980_s5 + $0xf8] sm:$0xff] }
  0x10   :  { %v247_v62 = vld [vmem:[%s980_s5 + $0x170] sm:$0xff]  ;;  %v614_v63 = vpack.c.bf16 %v232_v61, %v231_v60  ;;  %v248_v0 = vld [vmem:[%s980_s5 + $0x178] sm:$0xff] }
  0x11   :  { %573 = vmatpush3.bf16.msra.mxu0 %v572_v16  ;;  %v222_v16 = vld [vmem:[%s980_s5 + $0xa8] sm:$0xff]  ;;  %v215_v1 = vld [vmem:[%s980_s5 + $0x70] sm:$0xff]  ;;  %v216_v2 = vld [vmem:[%s980_s5 + $0x78] sm:$0xff] }
  0x12   :  { %574 = vmatprep.subr.bf16.mxu0 %v688_v6  ;;  %593 = vmatpush3.bf16.msra.mxu1 %v592_v14  ;;  %v594_v18 = vpack.c.bf16 %v222_v16, %v221_v15  ;;  %v616_v4 = vpack.c.bf16 %v216_v2, %v215_v1 }
  0x14   :  { %595 = vmatprep.subr.bf16.mxu1 %v594_v18 }
  0x15   :  { %576 = vmatpush3.bf16.msra.mxu0 %v575_v19  ;;  %v238_v19 = vld [vmem:[%s980_s5 + $0x128] sm:$0xff] }
  0x16   :  { %577 = vmatprep.subr.bf16.mxu0 %v688_v6  ;;  %597 = vmatpush3.bf16.msra.mxu1 %v596_v23 }
  0x19   :  { %579 = vmatpush3.bf16.msra.mxu0 %v578_v22  ;;  %v625_v22 = vpack.c.bf16 %v238_v19, %v237_v17 }
  0x1a   :  { %580 = vmatprep.subr.bf16.mxu0 %v688_v6 }
  0x1d   :  { %582 = vmatpush3.bf16.msra.mxu0 %v581_v25  ;;  %v224_v25 = vld [vmem:[%s980_s5 + $0xb8] sm:$0xff] }
  0x1e   :  { %583 = vmatprep.subr.bf16.mxu0 %v688_v6  ;;  %v598_v27 = vpack.c.bf16 %v224_v25, %v223_v24 }
  0x20   :  { %599 = vmatprep.subr.bf16.mxu1 %v598_v27 }
  0x21   :  { %585 = vmatpush3.bf16.msra.mxu0 %v584_v28  ;;  %v240_v28 = vld [vmem:[%s980_s5 + $0x138] sm:$0xff]  ;;  %601 = vmatpush3.bf16.msra.mxu1 %v600_v32 }
  0x22   :  { %618 = vmatprep.subr.bf16.mxu0 %v688_v6  ;;  %v628_v31 = vpack.c.bf16 %v240_v28, %v239_v26 }
  0x81   :  { %v32_v34 = vpop.permute.xlu0 %31 }
  0x82   :  { %v38_v38 = vmul.f32 %v37_v35, %v32_v34  ;;  %v226_v34 = vld [vmem:[%s980_s5 + $0xc8] sm:$0xff] }
  0x86   :  { %v41_v37 = vpop.permute.xlu0 %40 }
  0x87   :  { %v47_v39 = vmul.f32 %v46_v36, %v41_v37  ;;  %v242_v37 = vld [vmem:[%s980_s5 + $0x148] sm:$0xff] }
  0x89   :  { %v48_v41 = vadd.f32 %v47_v39, %v38_v38  ;;  %v209_v38 = vld [vmem:[%s980_s5 + $0x40] sm:$0xff]  ;;  %v210_v39 = vld [vmem:[%s980_s5 + $0x48] sm:$0xff] }
  0x8b   :  { %v56_v42 = vadd.f32 %v412_v40, %v48_v41  ;;  %v604_v41 = vpack.c.bf16 %v210_v39, %v209_v38 }
  0x8d   :  { %v57_v43 = vmin.f32 %v56_v42, 20.0  ;;  %vm60_vm2 = vcmp.gt.f32.partialorder %v56_v42, 20.0 }
  0x8f   :  { %v58_v44 = vmul.f32 1.442695, %v57_v43  ;;  %v228_v43 = vld [vmem:[%s980_s5 + $0xd8] sm:$0xff] }
  0x91   :  { %650 = vpow2.f32 %v58_v44  ;;  %v243_v44 = vld [vmem:[%s980_s5 + $0x150] sm:$0xff] }
  0x9b   :  { %v651_v45 = vpop.eup %650 }
  0x9c   :  { %v61_v46 = vadd.f32 1.0, %v651_v45  ;;  %v64_v47 = vmul.f32 -0.5, %v651_v45  ;;  %v67_v49 = vand.u32 2147483647, %v651_v45 }
  0x9e   :  { %652 = vlog2.f32 %v61_v46  ;;  %v65_v48 = vadd.f32 1.0, %v64_v47  ;;  %vm68_vm1 = vcmp.lt.f32.partialorder %v67_v49, 0.0004427343  ;;  %v211_v47 = vld [vmem:[%s980_s5 + $0x50] sm:$0xff] }
  0x9f   :  { %654 = vrcp.f32 %v61_v46  ;;  %v244_v46 = vld [vmem:[%s980_s5 + $0x158] sm:$0xff] }
  0xa0   :  { %v66_v53 = vmul.f32 %v651_v45, %v65_v48  ;;  %v212_v48 = vld [vmem:[%s980_s5 + $0x58] sm:$0xff]  ;;  %v634_v49 = vpack.c.bf16 %v244_v46, %v243_v44 }
  0xa8   :  { %v653_v50 = vpop.eup %652 }
  0xa9   :  { %v655_v51 = vpop.eup %654  ;;  %v63_v52 = vmul.f32 0.6931472, %v653_v50  ;;  %v608_v50 = vpack.c.bf16 %v212_v48, %v211_v47 }
  0xaa   :  { %v73_v54 = vmul.f32 %v655_v51, %v651_v45  ;;  %v229_v51 = vld [vmem:[%s980_s5 + $0xe0] sm:$0xff] }
  0xab   :  { %v69_v55 = vsel %vm68_vm1, %v66_v53, %v63_v52  ;;  %v230_v52 = vld [vmem:[%s980_s5 + $0xe8] sm:$0xff]  ;;  %v245_v53 = vld [vmem:[%s980_s5 + $0x160] sm:$0xff] }
  0xac   :  { %v70_v56 = vsel %vm60_vm2, %v56_v42, %v69_v55  ;;  %v74_v57 = vsel %vm60_vm2, 1.0, %v73_v54  ;;  %v227_v42 = vld [vmem:[%s980_s5 + $0xd0] sm:$0xff]  ;;  %v610_v54 = vpack.c.bf16 %v230_v52, %v229_v51  ;;  %v246_v55 = vld [vmem:[%s980_s5 + $0x168] sm:$0xff] }
  0xad   :  { %519 = vmatmul.mubr.f32.vlgmr.msra.gmra.mrb[0].mxu0 %v70_v56  ;;  %v75_v58 = vmul.f32 %v74_v57, %v37_v35  ;;  %v76_v59 = vmul.f32 %v74_v57, %v46_v36  ;;  %v241_v35 = vld [vmem:[%s980_s5 + $0x140] sm:$0xff]  ;;  %v602_v36 = vpack.c.bf16 %v226_v34, %v225_v33  ;;  %v606_v45 = vpack.c.bf16 %v228_v43, %v227_v42  ;;  %v214_v57 = vld [vmem:[%s980_s5 + $0x68] sm:$0xff] }
  0xae   :  { %521 = vmatprep.mubr.msk.f32.mxu0 %vm689_vm0, %v690_v13  ;;  %620 = vmatpush3.bf16.msra.mxu0 %v619_v3  ;;  %v631_v40 = vpack.c.bf16 %v242_v37, %v241_v35  ;;  %v213_v56 = vld [vmem:[%s980_s5 + $0x60] sm:$0xff]  ;;  %v640_v3 = vpack.c.bf16 %v248_v0, %v247_v62 }
  0xaf   :  { %621 = vmatprep.subr.bf16.mxu0 %v688_v6  ;;  %603 = vmatprep.subr.bf16.mxu1 %v602_v36  ;;  %v414_v33 = vld [vmem:[%s981_s6] ss:$0 sm:$0xff] }
  0xb0   :  { %605 = vmatpush3.bf16.msra.mxu1 %v604_v41 }
  0xb1   :  { %522 = vmatmul.mubr.f32.gmra.mrb[2].mxu0 %v75_v58  ;;  %607 = vmatprep.subr.bf16.mxu1 %v606_v45  ;;  %v637_v58 = vpack.c.bf16 %v246_v55, %v245_v53 }
  0xb2   :  { %524 = vmatprep.mubr.msk.f32.mxu0 %vm689_vm0, %v690_v13 }
  0xb4   :  { %609 = vmatpush3.bf16.msra.mxu1 %v608_v50 }
  0xb5   :  { %525 = vmatmul.mubr.f32.gmra.mrb[4].mxu0 %v76_v59  ;;  %v612_v59 = vpack.c.bf16 %v214_v57, %v213_v56  ;;  %611 = vmatprep.subr.bf16.mxu1 %v610_v54 }
  0xb6   :  { %559 = vmatprep.mubr.msk.f32.mxu0 %vm689_vm0, %v690_v13  ;;  %v622_v13 = vpack.c.bf16 %v236_v10, %v235_v8 }
  0xb8   :  { %623 = vmatpush3.bf16.msra.mxu0 %v622_v13  ;;  %613 = vmatpush3.bf16.msra.mxu1 %v612_v59 }
  0xb9   :  { %624 = vmatprep.subr.bf16.mxu0 %v688_v6  ;;  %615 = vmatprep.subr.bf16.mxu1 %v614_v63 }
  0xbc   :  { %626 = vmatpush3.bf16.msra.mxu0 %v625_v22  ;;  %617 = vmatpush3.bf16.msra.mxu1 %v616_v4 }
  0xbd   :  { %627 = vmatprep.subr.bf16.mxu0 %v688_v6 }
  0xc0   :  { %629 = vmatpush3.bf16.msra.mxu0 %v628_v31 }
  0xc1   :  { %630 = vmatprep.subr.bf16.mxu0 %v688_v6 }
  0xc4   :  { %632 = vmatpush3.bf16.msra.mxu0 %v631_v40 }
  0xc5   :  { %633 = vmatprep.subr.bf16.mxu0 %v688_v6 }
  0xc8   :  { %635 = vmatpush3.bf16.msra.mxu0 %v634_v49 }
  0xc9   :  { %636 = vmatprep.subr.bf16.mxu0 %v688_v6 }
  0xcc   :  { %638 = vmatpush3.bf16.msra.mxu0 %v637_v58 }
  0xcd   :  { %639 = vmatprep.subr.bf16.mxu0 %v688_v6  ;;  %v413_v6 = vld [vmem:[%s979_s4] ss:$0 sm:$0xff] }
  0xd0   :  { %641 = vmatpush3.bf16.msra.mxu0 %v640_v3 }
 0x180   :  { %v159_v5 = vpop.f32.mrb[0].mxu0 }
 0x181   :  { %v180_v7 = vadd.f32 %v413_v6, %v159_v5  ;;  %v520_v8 = vpop.f32.mrb[1].mxu0 }
 0x183   :  { %v181_v9 = vmin.f32 %v180_v7, 20.0  ;;  %vm184_vm3 = vcmp.gt.f32.partialorder %v180_v7, 20.0 }
 0x184   :  { %v164_v10 = vpop.f32.mrb[2].mxu0 }
 0x185   :  { %v182_v11 = vmul.f32 1.442695, %v181_v9  ;;  %v523_v12 = vpop.f32.mrb[3].mxu0 }
 0x187   :  { %656 = vpow2.f32 %v182_v11 }
 0x188   :  { %v169_v13 = vpop.f32.mrb[4].mxu0 }
 0x189   :  { %v526_v14 = vpop.f32.mrb[5].mxu0 }
 0x191   :  { %v657_v15 = vpop.eup %656 }
 0x192   :  { %v185_v16 = vadd.f32 1.0, %v657_v15  ;;  %v188_v17 = vmul.f32 -0.5, %v657_v15  ;;  %v191_v19 = vand.u32 2147483647, %v657_v15 }
 0x194   :  { %658 = vrcp.f32 %v185_v16  ;;  %v189_v18 = vadd.f32 1.0, %v188_v17  ;;  %vm192_vm4 = vcmp.lt.f32.partialorder %v191_v19, 0.0004427343 }
 0x195   :  { %660 = vlog2.f32 %v185_v16 }
 0x196   :  { %v190_v24 = vmul.f32 %v657_v15, %v189_v18 }
 0x19e   :  { %v659_v20 = vpop.eup %658 }
 0x19f   :  { %v661_v21 = vpop.eup %660  ;;  %v197_v22 = vmul.f32 %v659_v20, %v657_v15 }
 0x1a0   :  { %v187_v23 = vmul.f32 0.6931472, %v661_v21 }
 0x1a1   :  { %v198_v25 = vsel %vm184_vm3, 1.0, %v197_v22 }
 0x1a2   :  { %v200_v26 = vmul.f32 %v198_v25, %v169_v13  ;;  %v199_v27 = vmul.f32 %v198_v25, %v164_v10  ;;  %v193_v28 = vsel %vm192_vm4, %v190_v24, %v187_v23 }
 0x1a3   :  { %v194_v29 = vsel %vm184_vm3, %v180_v7, %v193_v28 }
 0x1a4   :  { %320 = vmatprep.mubr.f32.mxu1 %v199_v27  ;;  %560 = vmatmul.mubr.f32.vlgmr.msra.gmra.mrb[6].mxu0 %v200_v26 }
 0x1a5   :  { %321 = vmatmul.mubr.f32.vlgmr.msra.gmra.mrb[0].mxu1 %v194_v29 }
 0x277   :  { %v392_v30 = vpop.f32.mrb[6].mxu0 }
 0x278   :  { %v466_v31 = vpop.f32.mrb[0].mxu1  ;;  %v561_v32 = vpop.f32.mrb[7].mxu0 }
 0x279   :  { %v467_v34 = vpop.f32.mrb[1].mxu1 }
 0x27a   :  { %v468_v35 = vadd.f32 %v467_v34, %v466_v31 }
 0x27c   :  { %v323_v36 = vadd.f32 %v468_v35, %v414_v33 }
 0x27e   :  { %v393_v37 = vadd.f32 %v392_v30, %v323_v36 }
 0x280   :  { %397 = vst.msk [vmem:[#allocation2] sm:$0xff] %vm396_vm5, %v393_v37 }
 0x281   :  { %673 = shalt.err (!%p670_p4)
}
 0x282   :  { %s674_s6 = scalar_lea.hbm %s982_s7, 128 }
 0x283   :  { %p675_p5 = scmp.ne.s32.totalorder %s982_s7, %s674_s6  ;;  %p678_p6 = scmp.lt.u32.totalorder %s674_s6, %s982_s7 }
 0x285   :  { %p680_p7 = pnand %p678_p6, %p675_p5 }
 0x287   :  { %683 = shalt.err (!%p680_p7)
}
 0x288   :  { %407 = dma.vmem_to_hbm [thread:$0]  %s405_s29, 128, %s982_s7, [#allocation3]  }
 0x289   :  { %684 = dma.done.wait [#allocation3], 128  }
 0x28a   :  { %685 = vsyncadd [#allocation3], 4294967168 }
 0x28b   :  { %411 = vsyncpa [#allocation3], 1 }

</bundles_post_ra>
